<compile_context>
chip_gen: v7x
topology: tpu7x:2x2x1
jax: 0.10.0
libtpu: 0.0.40
codegen_flags: <defaults>
</compile_context>

<pallas_src>
import functools

import numpy as np
import jax
import jax.numpy as jnp
from jax.experimental import pallas as pl
from jax.experimental.pallas import tpu as pltpu


def _round_up(x, m):
    return (x + m - 1) // m * m


def _elu(x):
    # F.elu; elementwise math stays in f32 (v5e has no bf16 VPU/EUP).
    return jnp.where(x > 0, x, jnp.exp(jnp.minimum(x, 0.0)) - 1.0)


# ------------- Kernel 1: batched metapath 'linear' rnn + fused attn logits -------------

def _metapath_hidden_kernel(x_ref, w_ref, b_ref, attn_ref, hid_ref, a_ref, *, H, alpha):
    # x:(tile_e, D) bf16, w:(D, HD) bf16, b/attn:(1, HD) f32.
    hid = jnp.dot(x_ref[...], w_ref[...], preferred_element_type=jnp.float32) + b_ref[...]
    hid_ref[...] = hid.astype(hid_ref.dtype)          # bf16 writeback: halves K1 output bytes

    # attention logits a_h = sum_D(hid_h * attn_h), computed from the f32 accumulator.
    attn = attn_ref[...]                              # (1, HD), head-major packing
    D = x_ref.shape[1]
    cols = []
    for h in range(H):                                # H tiny & static -> unrolled
        cols.append(jnp.sum(hid[:, h * D:(h + 1) * D] * attn[:, h * D:(h + 1) * D],
                            axis=-1, keepdims=True))  # (tile_e, 1)
    a = jnp.concatenate(cols, axis=-1)                # (tile_e, H); 4-lane masked store is
    a_ref[...] = jnp.where(a >= 0, a, alpha * a)      # only 16 B/row -> acceptable


def metapath_hidden_batched_pallas(x, w, b, attn_flat, *, H, alpha, tile_e):
    """x:(M,E_pad,D), w:(M,D,HD), b/attn_flat:(M,1,HD).  Returns (hidden, a_logits)."""
    M, E_pad, D = x.shape
    HD = w.shape[2]
    assert E_pad % tile_e == 0
    return pl.pallas_call(
        functools.partial(_metapath_hidden_kernel, H=H, alpha=alpha),
        out_shape=(jax.ShapeDtypeStruct((M, E_pad, HD), x.dtype),       # bf16 hidden
                   jax.ShapeDtypeStruct((M, E_pad, H), jnp.float32)),   # attn logits
        grid=(M, E_pad // tile_e),
        in_specs=[pl.BlockSpec((None, tile_e, D), lambda m, e: (m, e, 0)),
                  pl.BlockSpec((None, D, HD), lambda m, e: (m, 0, 0)),
                  pl.BlockSpec((None, 1, HD), lambda m, e: (m, 0, 0)),
                  pl.BlockSpec((None, 1, HD), lambda m, e: (m, 0, 0))],
        out_specs=(pl.BlockSpec((None, tile_e, HD), lambda m, e: (m, e, 0)),
                   pl.BlockSpec((None, tile_e, H), lambda m, e: (m, e, 0))),
        compiler_params=pltpu.CompilerParams(
            dimension_semantics=("parallel", "parallel")),
    )(x, w, b, attn_flat)


# ----------------- Kernel 2a: ctr metapath-score reduction (2-slab) ------------------

def _ctr_logits_kernel(outs_ref, w1_ref, b1_ref, acc_ref, *, n_valid, total_tiles, tile_n):
    # outs_ref: (M, tile_n, HD) bf16; acc_ref: (M, A) per-slab resident accumulator.
    c = pl.program_id(0)                   # slab ('parallel'  -> both v7x TCs)
    i = pl.program_id(1)                   # node tile ('arbitrary' reduction axis)

    @pl.when(i == 0)
    def _init():
        acc_ref[...] = jnp.zeros_like(acc_ref)

    # Global node-tile this step maps to; index_map clamps the same way, so duplicated
    # steps (odd tile counts) re-read a valid block and are masked to zero here.
    step = c * pl.num_programs(1) + i
    blk = jnp.minimum(step, total_tiles - 1)
    start = blk * tile_n
    M = outs_ref.shape[0]
    row = jax.lax.broadcasted_iota(jnp.int32, (tile_n, 1), 0) + start
    # Mask = price of eliminating the materialized zero-pad copy of the (M,N,HD) tensor:
    # it also hides the garbage in the partial tail block (OOB reads are undefined).
    valid = (row < n_valid) & (step < total_tiles)

    w1 = w1_ref[...]
    b1 = b1_ref[...]
    parts = []
    for m in range(M):                                  # M tiny & static -> unrolled
        o = _elu(outs_ref[m].astype(jnp.float32))       # upcast right after load (v5e)
        fc1 = jnp.tanh(jnp.dot(o, w1, preferred_element_type=jnp.float32) + b1)
        fc1 = jnp.where(valid, fc1, 0.0)
        parts.append(jnp.sum(fc1, axis=0, keepdims=True))      # (1, A)
    acc_ref[...] = acc_ref[...] + jnp.concatenate(parts, axis=0)


# -------------------- Kernel 2b: ctr beta-weighted ELU sum ---------------------------

def _ctr_weighted_sum_kernel(outs_ref, beta_ref, h_ref):
    # outs_ref: (M, tile_n, HD) bf16; beta_ref: (M,) f32 scalars in SMEM.
    M = outs_ref.shape[0]
    acc = beta_ref[0] * _elu(outs_ref[0].astype(jnp.float32))
    for m in range(1, M):
        acc = acc + beta_ref[m] * _elu(outs_ref[m].astype(jnp.float32))
    h_ref[...] = acc                       # rows beyond N (partial tail) are dropped


def ctr_aggregate_pallas(outs, w1, b1, w2, *, tile_n=4096):
    """outs: (M, N, HD) bf16 (or f32).  Returns (N, HD) f32."""
    M, N, HD = outs.shape
    A = w1.shape[1]
    tile_n = min(tile_n, N)                # == N (full-dim block) or a multiple of 16
    total_tiles = pl.cdiv(N, tile_n)
    num_slabs = 2 if total_tiles >= 2 else 1
    tiles_per_slab = pl.cdiv(total_tiles, num_slabs)

    def outs_map(c, i):
        return (0, jnp.minimum(c * tiles_per_slab + i, total_tiles - 1), 0)

    # pass 1: node-tiled reduction; leading 'parallel' slab axis -> per-slab partials.
    partials = pl.pallas_call(
        functools.partial(_ctr_logits_kernel, n_valid=N,
                          total_tiles=total_tiles, tile_n=tile_n),
        out_shape=jax.ShapeDtypeStruct((num_slabs, M, A), jnp.float32),
        grid=(num_slabs, tiles_per_slab),
        in_specs=[pl.BlockSpec((M, tile_n, HD), outs_map),
                  pl.BlockSpec((HD, A), lambda c, i: (0, 0)),
                  pl.BlockSpec((1, A), lambda c, i: (0, 0))],
        out_specs=pl.BlockSpec((None, M, A), lambda c, i: (c, 0, 0)),
        compiler_params=pltpu.CompilerParams(
            dimension_semantics=("parallel", "arbitrary")),
    )(outs, w1, b1)

    # fc2 + softmax over M: O(M*A) scalars -> plain JAX.  Divide by the GLOBAL N.
    fc1_mean = jnp.sum(partials, axis=0) / N                       # (M, A)
    logits = jnp.sum(fc1_mean * w2[:, 0][None, :], axis=-1)        # (M,)
    beta = jax.nn.softmax(logits).astype(jnp.float32)              # (M,)

    # pass 2: beta-weighted ELU sum; beta lives in SMEM (no broadcast VMEM stream).
    h = pl.pallas_call(
        _ctr_weighted_sum_kernel,
        out_shape=jax.ShapeDtypeStruct((N, HD), jnp.float32),
        grid=(total_tiles,),
        in_specs=[pl.BlockSpec((M, tile_n, HD), lambda i: (0, i, 0)),
                  pl.BlockSpec(memory_space=pltpu.MemorySpace.SMEM)],
        out_specs=pl.BlockSpec((tile_n, HD), lambda i: (i, 0)),
        compiler_params=pltpu.CompilerParams(
            dimension_semantics=("parallel",)),
    )(outs, beta)
    return h


# ----------------------------------- JAX glue ----------------------------------------

def ctr_aggregate_ref(outs, w1, b1, w2):
    o = _elu(outs.astype(jnp.float32))
    fc1 = jnp.tanh(jnp.einsum('mnk,ka->mna', o, w1) + b1)          # (M, N, A)
    fc1_mean = jnp.mean(fc1, axis=1)                               # (M, A)
    logits = (fc1_mean @ w2)[:, 0]                                 # (M,)
    beta = jax.nn.softmax(logits)
    return jnp.sum(beta[:, None, None] * o, axis=0)


def magnn_forward(features, indices_list, mp_params, w1, b1, w2,
                  type_mask_np, target_n_type, H, D, *,
                  alpha=0.01, tile_e=2048, tile_n=4096,
                  use_pallas=True, low_precision=True):
    """Full forward: M x MAGNN_metapath_specific ('linear' rnn, attn_switch=False,
    attn_drop=0) followed by the ctr-level attention aggregation."""
    M = len(indices_list)
    HD = H * D
    store_dtype = jnp.bfloat16 if low_precision else jnp.float32

    target_nodes = np.where(type_mask_np == target_n_type)[0].tolist()
    N = len(target_nodes)
    feats_t = jnp.take(features, jnp.asarray(target_nodes, jnp.int32), axis=0)

    max_E = max(int(np.asarray(idx).shape[0]) for idx in indices_list)
    tile_e = min(tile_e, _round_up(max_E, 16))          # 16-row min: bf16 sublane packing
    E_pad = _round_up(max_E, tile_e)                    # common pad -> one batched K1 call

    x_rows, w_rows, b_rows, attn_rows, meta = [], [], [], [], []
    for m in range(M):
        indices_np = np.asarray(indices_list[m])
        w_rnn, b_rnn, attn = mp_params[m]
        E, L = indices_np.shape

        # host-side graph bookkeeping (get_sorted_relevant_nidxs / get_target_node_idxs)
        relevant = sorted(set(indices_np[:, 0].tolist()) | set(indices_np[:, -1].tolist()))
        full_to_local = {n: i for i, n in enumerate(relevant)}
        target_node_idxs = sorted(set(indices_np[:, -1].tolist()))
        target_local = np.array([full_to_local[t] for t in target_node_idxs], np.int32)
        dst_local = np.array([full_to_local[t] for t in indices_np[:, -1].tolist()], np.int32)
        P = len(relevant)
        dst_pad = np.full((E_pad,), P, np.int32)        # padded edges -> dummy segment P
        dst_pad[:E] = dst_local
        fill_emb_idx = np.array([target_nodes.index(i) for i in target_node_idxs], np.int32)
        meta.append((P, jnp.asarray(dst_pad), jnp.asarray(target_local),
                     jnp.asarray(fill_emb_idx)))

        # edata = F.embedding(edge_metapath_indices, features); 'linear' takes the mean
        # over the L positions.  Accumulated per position so (E, L, D) never hits HBM.
        # TODO(synk): fuse this row gather + mean into K1 (resident feature table in
        #             VMEM + in-kernel gather of the scalar-prefetched index table).
        idx = jnp.asarray(indices_np, jnp.int32)
        mean_edata = jnp.take(features, idx[:, 0], axis=0)
        for l in range(1, L):
            mean_edata = mean_edata + jnp.take(features, idx[:, l], axis=0)
        mean_edata = mean_edata / float(L)

        x_rows.append(jnp.zeros((E_pad, D), store_dtype)
                      .at[:E].set(mean_edata.astype(store_dtype)))
        w_rows.append(w_rnn.astype(store_dtype))
        b_rows.append(b_rnn.reshape(1, HD))
        attn_rows.append(attn.reshape(1, HD))           # head-major lane packing

    x = jnp.stack(x_rows)                               # (M, E_pad, D)   bf16
    w = jnp.stack(w_rows)                               # (M, D, HD)      bf16
    b = jnp.stack(b_rows)                               # (M, 1, HD)      f32
    attn_f = jnp.stack(attn_rows)                       # (M, 1, HD)      f32

    # K1: hidden = mean(edata) @ W_rnn + b  (bf16 MXU / f32 acc) + fused attn logits.
    if use_pallas:
        hidden, a_all = metapath_hidden_batched_pallas(
            x, w, b, attn_f, H=H, alpha=alpha, tile_e=tile_e)
    else:
        hid_f32 = jnp.einsum('med,mdk->mek', x, w,
                             preferred_element_type=jnp.float32) + b
        hidden = hid_f32.astype(store_dtype)
        a_all = jnp.sum(hid_f32.reshape(M, E_pad, H, D)
                        * attn_f.reshape(M, 1, H, D), axis=-1)
        a_all = jnp.where(a_all >= 0, a_all, alpha * a_all)

    # TODO(synk): DGL edge_softmax + fn.sum message passing (data-dependent segment
    #             softmax / scatter-add over graph edges) stays in plain JAX.
    outs = []
    for m in range(M):
        P, dst_pad, target_local, fill_emb_idx = meta[m]
        S = P + 1                                       # +1 dummy segment for padding
        eft = hidden[m].reshape(E_pad, H, D)
        a = a_all[m]                                    # (E_pad, H) f32
        amax = jax.ops.segment_max(a, dst_pad, num_segments=S)
        a_exp = jnp.exp(a - amax[dst_pad])
        asum = jax.ops.segment_sum(a_exp, dst_pad, num_segments=S)
        a_sm = a_exp / asum[dst_pad]
        ft = jax.ops.segment_sum(eft.astype(jnp.float32) * a_sm[:, :, None],
                                 dst_pad, num_segments=S)
        new_nf = ft[target_local]                       # (T, H, D)
        ret = jnp.tile(feats_t[:, None, :], (1, H, 1))  # (N, H, D)
        ret = ret.at[fill_emb_idx].set(new_nf)
        outs.append(ret.reshape(N, HD).astype(store_dtype))
    outs = jnp.stack(outs)                              # (M, N, HD) bf16 -> halves K2 bytes

    if use_pallas:
        return ctr_aggregate_pallas(outs, w1, b1, w2, tile_n=tile_n)
    return ctr_aggregate_ref(outs, w1, b1, w2)


# --------------------------------------- main ----------------------------------------

if __name__ == "__main__":
    D = 32          # out_dim
    H = 4           # num_heads
    HD = H * D
    A = 16          # attn_vec_dim
    M = 2           # num_metapaths
    num_nodes = 16

    type_mask_np = np.array([0] * 8 + [1] * 8, dtype=np.int32)
    target_n_type = 1

    key = jax.random.PRNGKey(0)
    keys = jax.random.split(key, 16)

    features = jax.random.normal(keys[0], (num_nodes, D), dtype=jnp.float32)

    # metapath-instance index tables (last column = target-type endpoint)
    idx0 = np.stack([np.asarray(jax.random.randint(keys[1], (8,), 0, 8)),
                     np.asarray(jax.random.randint(keys[2], (8,), 0, 16)),
                     np.asarray(jax.random.randint(keys[3], (8,), 8, 16))],
                    axis=1).astype(np.int32)            # (8, 3)
    idx1 = np.stack([np.asarray(jax.random.randint(keys[4], (16,), 0, 8)),
                     np.asarray(jax.random.randint(keys[5], (16,), 8, 16))],
                    axis=1).astype(np.int32)            # (16, 2)
    indices_list = [idx0, idx1]

    def xavier(k, shape, fan_in, fan_out, gain=1.414):
        std = gain * np.sqrt(2.0 / (fan_in + fan_out))
        return (std * jax.random.normal(k, shape)).astype(jnp.float32)

    # per-metapath parameters: 'linear' rnn + attn vector
    mp_params = []
    for m in range(M):
        w_rnn = xavier(keys[6 + 2 * m], (D, HD), D, HD, gain=1.0)
        b_rnn = jnp.zeros((1, HD), dtype=jnp.float32)
        attn = xavier(keys[7 + 2 * m], (1, H, D), D, H)
        mp_params.append((w_rnn, b_rnn, attn))

    # ctr-level parameters: fc1 (H*D -> A, bias), fc2 (A -> 1, no bias)
    w1 = xavier(keys[12], (HD, A), HD, A)
    b1 = jnp.zeros((1, A), dtype=jnp.float32)
    w2 = xavier(keys[13], (A, 1), A, 1)

    # Pallas path (bf16 streams) ...
    h = magnn_forward(features, indices_list, mp_params, w1, b1, w2,
                      type_mask_np, target_n_type, H, D,
                      use_pallas=True, low_precision=True)
    h = jax.block_until_ready(h)

    # ... matched-precision pure-JAX reference (same bf16 casts) ...
    h_ref = magnn_forward(features, indices_list, mp_params, w1, b1, w2,
                          type_mask_np, target_n_type, H, D,
                          use_pallas=False, low_precision=True)
    # ... and a full-f32 reference (validates the bf16 pipeline against f32 semantics).
    h_f32 = magnn_forward(features, indices_list, mp_params, w1, b1, w2,
                          type_mask_np, target_n_type, H, D,
                          use_pallas=False, low_precision=False)

    assert h.shape == (8, HD)
    np.testing.assert_allclose(np.asarray(h), np.asarray(h_ref), rtol=2e-2, atol=2e-2)
    np.testing.assert_allclose(np.asarray(h), np.asarray(h_f32), rtol=1e-1, atol=1e-1)
    print("KERNEL_OK")
</pallas_src>

<mosaic_0001>
module attributes {stable_mosaic.version = 11 : i64} {
  func.func @_metapath_hidden_kernel(%arg0: i32, %arg1: i32, %arg2: memref<1x16x32xbf16, #tpu.memory_space<vmem>>, %arg3: memref<1x32x128xbf16, #tpu.memory_space<vmem>>, %arg4: memref<1x1x128xf32, #tpu.memory_space<vmem>>, %arg5: memref<1x1x128xf32, #tpu.memory_space<vmem>>, %arg6: memref<1x16x128xbf16, #tpu.memory_space<vmem>>, %arg7: memref<1x16x4xf32, #tpu.memory_space<vmem>>) attributes {dimension_semantics = [#tpu.dimension_semantics<parallel>, #tpu.dimension_semantics<parallel>], iteration_bounds = array<i64: 2, 1>, scalar_prefetch = 0 : i64, scratch_operands = 0 : i64, tpu.core_type = #tpu.core_type<tc>, window_params = [{transform_indices = @transform_0, window_bounds = array<i64: 1, 16, 32>}, {transform_indices = @transform_1, window_bounds = array<i64: 1, 32, 128>}, {transform_indices = @transform_2, window_bounds = array<i64: 1, 1, 128>}, {transform_indices = @transform_3, window_bounds = array<i64: 1, 1, 128>}, {transform_indices = @transform_4, window_bounds = array<i64: 1, 16, 128>}, {transform_indices = @transform_5, window_bounds = array<i64: 1, 16, 4>}]} {
    %c0 = arith.constant 0 : index
    %c0_0 = arith.constant 0 : index
    %c0_1 = arith.constant 0 : index
    %0 = vector.load %arg2[%c0, %c0_0, %c0_1] : memref<1x16x32xbf16, #tpu.memory_space<vmem>>, vector<1x16x32xbf16>
    %1 = vector.shape_cast %0 : vector<1x16x32xbf16> to vector<16x32xbf16>
    %c0_2 = arith.constant 0 : index
    %c0_3 = arith.constant 0 : index
    %c0_4 = arith.constant 0 : index
    %2 = vector.load %arg3[%c0_2, %c0_3, %c0_4] : memref<1x32x128xbf16, #tpu.memory_space<vmem>>, vector<1x32x128xbf16>
    %3 = vector.shape_cast %2 : vector<1x32x128xbf16> to vector<32x128xbf16>
    %cst = arith.constant dense<0.000000e+00> : vector<16x128xf32>
    %4 = tpu.matmul %1, %3, %cst {dimension_numbers = #tpu.dot_dimension_numbers<[1], [0], [0], [1], [0, 0, 1, 1], [], []>} : vector<16x32xbf16>, vector<32x128xbf16>, vector<16x128xf32> -> vector<16x128xf32>
    %c0_5 = arith.constant 0 : index
    %c0_6 = arith.constant 0 : index
    %c0_7 = arith.constant 0 : index
    %5 = vector.load %arg4[%c0_5, %c0_6, %c0_7] : memref<1x1x128xf32, #tpu.memory_space<vmem>>, vector<1x1x128xf32>
    %6 = vector.shape_cast %5 : vector<1x1x128xf32> to vector<1x128xf32>
    %7 = vector.broadcast %6 : vector<1x128xf32> to vector<16x128xf32>
    %8 = arith.addf %4, %7 : vector<16x128xf32>
    %9 = arith.truncf %8 : vector<16x128xf32> to vector<16x128xbf16>
    %c0_8 = arith.constant 0 : index
    %c0_9 = arith.constant 0 : index
    %c0_10 = arith.constant 0 : index
    %10 = vector.load %arg6[%c0_8, %c0_9, %c0_10] : memref<1x16x128xbf16, #tpu.memory_space<vmem>>, vector<1x16x128xbf16>
    %11 = vector.shape_cast %10 : vector<1x16x128xbf16> to vector<16x128xbf16>
    %12 = vector.shape_cast %9 : vector<16x128xbf16> to vector<1x16x128xbf16>
    tpu.vector_store %arg6[%c0_8, %c0_9, %c0_10], %12 {strides = array<i32>} : memref<1x16x128xbf16, #tpu.memory_space<vmem>>, vector<1x16x128xbf16>,
    %c0_11 = arith.constant 0 : index
    %c0_12 = arith.constant 0 : index
    %c0_13 = arith.constant 0 : index
    %13 = vector.load %arg5[%c0_11, %c0_12, %c0_13] : memref<1x1x128xf32, #tpu.memory_space<vmem>>, vector<1x1x128xf32>
    %14 = vector.shape_cast %13 : vector<1x1x128xf32> to vector<1x128xf32>
    %15 = vector.extract_strided_slice %8 {offsets = [0, 0], sizes = [16, 32], strides = [1, 1]} : vector<16x128xf32> to vector<16x32xf32>
    %16 = vector.extract_strided_slice %14 {offsets = [0, 0], sizes = [1, 32], strides = [1, 1]} : vector<1x128xf32> to vector<1x32xf32>
    %17 = vector.broadcast %16 : vector<1x32xf32> to vector<16x32xf32>
    %18 = arith.mulf %15, %17 : vector<16x32xf32>
    %cst_14 = arith.constant dense<0.000000e+00> : vector<16xf32>
    %19 = vector.multi_reduction <add>, %18, %cst_14 [1] : vector<16x32xf32> to vector<16xf32>
    %20 = vector.shape_cast %19 : vector<16xf32> to vector<16x1xf32>
    %21 = vector.extract_strided_slice %8 {offsets = [0, 32], sizes = [16, 32], strides = [1, 1]} : vector<16x128xf32> to vector<16x32xf32>
    %22 = vector.extract_strided_slice %14 {offsets = [0, 32], sizes = [1, 32], strides = [1, 1]} : vector<1x128xf32> to vector<1x32xf32>
    %23 = vector.broadcast %22 : vector<1x32xf32> to vector<16x32xf32>
    %24 = arith.mulf %21, %23 : vector<16x32xf32>
    %cst_15 = arith.constant dense<0.000000e+00> : vector<16xf32>
    %25 = vector.multi_reduction <add>, %24, %cst_15 [1] : vector<16x32xf32> to vector<16xf32>
    %26 = vector.shape_cast %25 : vector<16xf32> to vector<16x1xf32>
    %27 = vector.extract_strided_slice %8 {offsets = [0, 64], sizes = [16, 32], strides = [1, 1]} : vector<16x128xf32> to vector<16x32xf32>
    %28 = vector.extract_strided_slice %14 {offsets = [0, 64], sizes = [1, 32], strides = [1, 1]} : vector<1x128xf32> to vector<1x32xf32>
    %29 = vector.broadcast %28 : vector<1x32xf32> to vector<16x32xf32>
    %30 = arith.mulf %27, %29 : vector<16x32xf32>
    %cst_16 = arith.constant dense<0.000000e+00> : vector<16xf32>
    %31 = vector.multi_reduction <add>, %30, %cst_16 [1] : vector<16x32xf32> to vector<16xf32>
    %32 = vector.shape_cast %31 : vector<16xf32> to vector<16x1xf32>
    %33 = vector.extract_strided_slice %8 {offsets = [0, 96], sizes = [16, 32], strides = [1, 1]} : vector<16x128xf32> to vector<16x32xf32>
    %34 = vector.extract_strided_slice %14 {offsets = [0, 96], sizes = [1, 32], strides = [1, 1]} : vector<1x128xf32> to vector<1x32xf32>
    %35 = vector.broadcast %34 : vector<1x32xf32> to vector<16x32xf32>
    %36 = arith.mulf %33, %35 : vector<16x32xf32>
    %cst_17 = arith.constant dense<0.000000e+00> : vector<16xf32>
    %37 = vector.multi_reduction <add>, %36, %cst_17 [1] : vector<16x32xf32> to vector<16xf32>
    %38 = vector.shape_cast %37 : vector<16xf32> to vector<16x1xf32>
    %39 = tpu.concatenate %20, %26, %32, %38 in 1 : vector<16x1xf32>, vector<16x1xf32>, vector<16x1xf32>, vector<16x1xf32> -> vector<16x4xf32>
    %cst_18 = arith.constant 0.000000e+00 : f32
    %40 = vector.broadcast %cst_18 : f32 to vector<16x4xf32>
    %41 = arith.cmpf oge, %39, %40 : vector<16x4xf32>
    %cst_19 = arith.constant 0.00999999977 : f32
    %42 = vector.broadcast %cst_19 : f32 to vector<16x4xf32>
    %43 = arith.mulf %42, %39 : vector<16x4xf32>
    %44 = arith.select %41, %39, %43 : vector<16x4xi1>, vector<16x4xf32>
    %c0_20 = arith.constant 0 : index
    %c0_21 = arith.constant 0 : index
    %c0_22 = arith.constant 0 : index
    %45 = vector.load %arg7[%c0_20, %c0_21, %c0_22] : memref<1x16x4xf32, #tpu.memory_space<vmem>>, vector<1x16x4xf32>
    %46 = vector.shape_cast %45 : vector<1x16x4xf32> to vector<16x4xf32>
    %47 = vector.shape_cast %44 : vector<16x4xf32> to vector<1x16x4xf32>
    tpu.vector_store %arg7[%c0_20, %c0_21, %c0_22], %47 {strides = array<i32>} : memref<1x16x4xf32, #tpu.memory_space<vmem>>, vector<1x16x4xf32>,
    return
  }
  func.func @transform_0(%arg0: i32, %arg1: i32) -> (i32, i32, i32) {
    %c0_i32 = arith.constant 0 : i32
    %c0_i32_0 = arith.constant 0 : i32
    return %arg0, %arg1, %c0_i32 : i32, i32, i32
  }
  func.func @transform_1(%arg0: i32, %arg1: i32) -> (i32, i32, i32) {
    %c0_i32 = arith.constant 0 : i32
    %c0_i32_0 = arith.constant 0 : i32
    %c0_i32_1 = arith.constant 0 : i32
    return %arg0, %c0_i32, %c0_i32_0 : i32, i32, i32
  }
  func.func @transform_2(%arg0: i32, %arg1: i32) -> (i32, i32, i32) {
    %c0_i32 = arith.constant 0 : i32
    %c0_i32_0 = arith.constant 0 : i32
    %c0_i32_1 = arith.constant 0 : i32
    return %arg0, %c0_i32, %c0_i32_0 : i32, i32, i32
  }
  func.func @transform_3(%arg0: i32, %arg1: i32) -> (i32, i32, i32) {
    %c0_i32 = arith.constant 0 : i32
    %c0_i32_0 = arith.constant 0 : i32
    %c0_i32_1 = arith.constant 0 : i32
    return %arg0, %c0_i32, %c0_i32_0 : i32, i32, i32
  }
  func.func @transform_4(%arg0: i32, %arg1: i32) -> (i32, i32, i32) {
    %c0_i32 = arith.constant 0 : i32
    %c0_i32_0 = arith.constant 0 : i32
    return %arg0, %arg1, %c0_i32 : i32, i32, i32
  }
  func.func @transform_5(%arg0: i32, %arg1: i32) -> (i32, i32, i32) {
    %c0_i32 = arith.constant 0 : i32
    %c0_i32_0 = arith.constant 0 : i32
    return %arg0, %arg1, %c0_i32 : i32, i32, i32
  }
}

</mosaic_0001>

<bundles_post_ra>
// kernel: tpu_custom_call.1
= control target key start
LH: loop header
LB: loop body
LE: loop exit
PB: predicated region body
PF: predicated region fallthrough
CT: control target
= control target key end

     0   :  { %s1292_s0 = inlined_call_operand.hbm [shape: bf16[2,16,32], index: 0, kind: input, shape index: {}]   ;;  %s1293_s1 = inlined_call_operand.hbm [shape: bf16[2,32,128], index: 1, kind: input, shape index: {}]   ;;  %s1294_s2 = inlined_call_operand.vmem [shape: f32[2,1,128], index: 2, kind: input, shape index: {}]   ;;  %s1295_s3 = inlined_call_operand.vmem [shape: f32[2,1,128], index: 3, kind: input, shape index: {}]   ;;  %s1296_s4 = inlined_call_operand.hbm [shape: bf16[2,16,128], index: 4, kind: output, shape index: {0}]   ;;  %s1297_s5 = inlined_call_operand.vmem [shape: f32[2,16,4], index: 5, kind: output, shape index: {1}]  }
   0x1   :  { %1301 = sst [smem:[#allocation11_spill]] %s1292_s0 }
   0x2   :  { %11 = vsyncpa [#allocation3], 0 }
   0x3   :  { %13 = vsyncpa [#allocation3 + $0x1], 0 }
   0x4   :  { %14 = vsyncpa [#allocation6], 0 }
   0x5   :  { %16 = vsyncpa [#allocation6 + $0x1], 0 }
   0x6   :  { %17 = vsyncpa [#allocation4], 0 }
   0x7   :  { %19 = vsyncpa [#allocation4 + $0x1], 0  ;;  %s1024_s18 = smov 0   ;;  %s1026_s19 = smov 0  }
   0x8   :  { %s1028_s20 = smov 0   ;;  %s1030_s21 = smov 0  }
   0x9   :  { %s1032_s22 = smov 0   ;;  %s1034_s23 = smov 0  }
   0xa LB: > { %s706_s24 = sadd.s32 4294967295, %s981_s23   ;;  %s707_s25 = sadd.s32 4294967294, %s981_s23   ;;  %s981_s23 = sphi %s1034_s23, %s25_s23   ;;  %s977_s22 = sphi %s1032_s22, %s1319_s22   ;;  %s973_s21 = sphi %s1030_s21, %s1318_s21   ;;  %s969_s20 = sphi %s1028_s20, %s1317_s20   ;;  %s965_s19 = sphi %s1026_s19, %s1316_s19   ;;  %s961_s18 = sphi %s1024_s18, %s1315_s18  }
   0xb   : > { %s37_s26 = sadd.s32 1, %s977_s22  ;;  %s46_s27 = sadd.s32 1, %s969_s20 }
   0xc   : > { %p39_p0 = scmp.ge.s32.totalorder %s37_s26, 2  ;;  %p53_p1 = scmp.ne.s32.totalorder %s969_s20, %s965_s19 }
   0xd   : > { %p54_p2 = scmp.eq.s32.totalorder %s981_s23, 0  ;;  %p59_p3 = scmp.ne.s32.totalorder %s965_s19, %s961_s18 }
   0xe   : > { %s1321_s26 = smov (%p39_p0, %s37_s26), 0  ;;  %p60_p5 = scmp.eq.s32.totalorder %s706_s24, 0 }
   0xf   : > { %p1065_p4 = por %p54_p2, %p53_p1  ;;  %s41_s29 = ssub.s32 %s977_s22, %s1321_s26 }
  0x10   : > { %p163_p6 = scmp.eq.s32.totalorder %s706_s24, 1  ;;  %p44_p7 = scmp.eq.s32.totalorder %s41_s29, 0 }
  0x11   : > { %p1071_p8 = por %p60_p5, %p59_p3  ;;  %p169_p10 = scmp.eq.s32.totalorder %s707_s25, 1 }
  0x12   : > { %p1075_p9 = por %p163_p6, %p53_p1  ;;  %p774_p13 = scmp.lt.s32.totalorder %s981_s23, 2 }
  0x13   : > { %s1303_s30 = scalar_select %p1071_p8, 1, 0 }
  0x14   : > { %s1304_s6 = scalar_select %p1075_p9, 1, 0 }
  0x15   : > { %s1080_s7 = scalar_select %p44_p7, %s969_s20, %s46_s27  }
  0x16   : > { %p1082_p11 = por %p169_p10, %p59_p3  ;;  %s1089_s9 = sand.u32 1, %s969_s20  }
  0x17   : > { %s710_s10 = sshll.u32 %s1089_s9, 3  ;;  %s735_s11 = sshll.u32 %s977_s22, 7 }
  0x18   : > { %s1305_s8 = scalar_select %p1082_p11, 1, 0 }
  0x19   : > { %s1306_s0 = sld [smem:[#allocation11_spill]]  ;;  %s221_s15 = scalar_lea.vmem [#allocation2], %s710_s10 }
  0x1a   : > { %s230_s16 = sshll.u32 %s221_s15, 4  ;;  %p1102_p0 = pnand %p774_p13, %p1065_p4  ;;  %s1098_s16 = int_to_ptr.vmem [resolvable:$true] %s230_s16 }
  0x1b   : > { %s218_s24 = scalar_lea.sflag [#allocation3], %s1089_s9 }
  0x1c   : > { %p837_p3 = pneg %p1102_p0 }
  0x1f   : > { %s1096_s14 = scalar_lea.hbm %s1306_s0, %s735_s11  ;;  %s840_s28 = scalar_lea.hbm %s1306_s0, 256 }
  0x20   : > { %s835_s25 = scalar_lea.hbm %s1096_s14, 128  ;;  %p841_p4 = scmp.lt.u32.totalorder %s1096_s14, %s1306_s0 }
  0x21   : > { %p836_p2 = scmp.ne.s32.totalorder %s1096_s14, %s835_s25  ;;  %p842_p7 = scmp.lt.u32.totalorder %s840_s28, %s835_s25 }
  0x22   : > { %p844_p13 = scmp.lt.u32.totalorder %s835_s25, %s1096_s14 }
  0x23   : > { %p838_p5 = pnand %p837_p3, %p836_p2  ;;  %p843_p10 = por %p842_p7, %p841_p4 }
  0x25   : > { %p839_p6 = pneg %p838_p5  ;;  %p845_p12 = por %p844_p13, %p843_p10 }
  0x27   : > { %p846_p1 = pnand %p845_p12, %p839_p6 }
  0x29   : > { %849 = shalt.err (!%p846_p1)
}
  0x2a   : > { %s850_s12 = scalar_lea.vmem %s1098_s16, 128  ;;  %s983_s13 = smov [#allocation2]  }
  0x2b   : > { %p851_p2 = scmp.ne.s32.totalorder %s1098_s16, %s850_s12  ;;  %s855_s15 = sshll.u32 %s983_s13, 4  ;;  %s856_s15 = int_to_ptr.vmem [resolvable:$false] %s855_s15 }
  0x2c   : > { %s857_s27 = scalar_lea.vmem %s856_s15, 256  ;;  %p858_p9 = scmp.lt.s32.totalorder %s1098_s16, %s856_s15 }
  0x2d   : > { %p853_p5 = pnand %p851_p2, %p837_p3  ;;  %p859_p4 = scmp.lt.s32.totalorder %s857_s27, %s850_s12 }
  0x2f   : > { %p854_p11 = pneg %p853_p5  ;;  %p860_p7 = por %p859_p4, %p858_p9 }
  0x31   : > { %p861_p10 = pnand %p860_p7, %p854_p11 }
  0x33   : > { %864 = shalt.err (!%p861_p10)
}
  0x34   : > { %s1299_s25 = smov 64   ;;  %s985_s29 = smov 4  }
  0x35   : > { %766 = dma.hbm_to_vmem [thread:$0]  (!%p1102_p0), %s1096_s14, 128, %s1098_s16, %s218_s24, %s1299_s25, %s1299_s25, %s985_s29  }
  0x36   : > { %p271_p9 = scmp.lt.s32.totalorder %s981_s23, 3  ;;  %s713_s28 = sshll.u32 %s1089_s9, 4 }
  0x37   : > { %s736_s10 = sshll.u32 %s977_s22, 8  ;;  %p1308_p11 = scmp.ge.s32.totalorder %s981_s23, 1 }
  0x38   : > { %s1150_s15 = scalar_lea.hbm %s1293_s1, %s736_s10  ;;  %s244_s27 = scalar_lea.vmem [#allocation5], %s713_s28 }
  0x39   : > { %p1143_p12 = pnand %p1308_p11, %p271_p9  ;;  %s251_s0 = sshll.u32 %s244_s27, 4  ;;  %s1152_s0 = int_to_ptr.vmem [resolvable:$true] %s251_s0 }
  0x3a   : > { %s241_s14 = scalar_lea.sflag [#allocation6], %s1089_s9  ;;  %s865_s16 = scalar_lea.hbm %s1150_s15, 256 }
  0x3b   : > { %p866_p1 = scmp.ne.s32.totalorder %s1150_s15, %s865_s16  ;;  %s870_s10 = scalar_lea.hbm %s1293_s1, 512 }
  0x3c   : > { %p871_p2 = scmp.lt.u32.totalorder %s1150_s15, %s1293_s1  ;;  %p872_p5 = scmp.lt.u32.totalorder %s870_s10, %s865_s16 }
  0x3d   : > { %p868_p6 = pnand %p866_p1, %p837_p3  ;;  %p874_p7 = scmp.lt.u32.totalorder %s865_s16, %s1150_s15 }
  0x3e   : > { %p873_p4 = por %p872_p5, %p871_p2 }
  0x3f   : > { %p869_p13 = pneg %p868_p6 }
  0x40   : > { %p875_p10 = por %p874_p7, %p873_p4 }
  0x42   : > { %p876_p9 = pnand %p875_p10, %p869_p13 }
  0x44   : > { %879 = shalt.err (!%p876_p9)
}
  0x45   : > { %s880_s28 = scalar_lea.vmem %s1152_s0, 256  ;;  %s986_s25 = smov [#allocation5]  }
  0x46   : > { %p881_p11 = scmp.ne.s32.totalorder %s1152_s0, %s880_s28  ;;  %s885_s27 = sshll.u32 %s986_s25, 4  ;;  %s886_s27 = int_to_ptr.vmem [resolvable:$false] %s885_s27 }
  0x47   : > { %s887_s24 = scalar_lea.vmem %s886_s27, 512  ;;  %p888_p8 = scmp.lt.s32.totalorder %s1152_s0, %s886_s27 }
  0x48   : > { %p883_p1 = pnand %p881_p11, %p837_p3  ;;  %p889_p2 = scmp.lt.s32.totalorder %s887_s24, %s880_s28 }
  0x4a   : > { %p884_p6 = pneg %p883_p1  ;;  %p890_p5 = por %p889_p2, %p888_p8 }
  0x4c   : > { %p891_p4 = pnand %p890_p5, %p884_p6 }
  0x4e   : > { %894 = shalt.err (!%p891_p4)
}
  0x4f   : > { %s1310_s16 = smov 64   ;;  %275 = sbr.rel (%p1143_p12) target bundleno = 590 (0x24e), region = 36 }
  0x50   : > { %769 = dma.hbm_to_vmem [thread:$0]  (!%p1102_p0), %s1150_s15, 256, %s1152_s0, %s241_s14, %s1310_s16, %s1310_s16, %s985_s29  }
  0x51   : > { %s1186_s10 = sand.u32 (!%p1143_p12), 1, %s965_s19   ;;  %p1311_p8 = scmp.ne.s32.totalorder (!%p1143_p12), %s1303_s30, 0 }
  0x52   : > { %s717_s12 = sshll.u32 (!%p1143_p12), %s1186_s10, 3  ;;  %s278_s17 = scalar_lea.sflag (!%p1143_p12), [#allocation3], %s1186_s10 }
  0x53   : > { %s281_s13 = scalar_lea.vmem (!%p1143_p12), [#allocation2], %s717_s12 }
  0x56   : > { %948 = dma.done.wait (%p1311_p8), %s278_s17, 128  }
  0x57   : > { %950 = vsyncadd (%p1311_p8), %s278_s17, 4294967168  ;;  %s718_s0 = sshll.u32 %s1186_s10, 4  ;;  %s287_s9 = scalar_lea.sflag [#allocation6], %s1186_s10 }
  0x58   : > { %s290_s29 = scalar_lea.vmem [#allocation5], %s718_s0 }
  0x59   : > { %952 = dma.done.wait (%p1311_p8), %s287_s9, 256  }
  0x5a   : > { %954 = vsyncadd (%p1311_p8), %s287_s9, 4294967040  ;;  %v987_v0 = vmov 0.0   ;;  %vm988_vm0 = vmmov 0   ;;  %v832_v1 = vld [vmem:[%s290_s29] sm:$0xff]   ;;  %v833_v2 = vld [vmem:[%s290_s29 + $0x8] sm:$0xff]   ;;  %vm386_vm1 = vcmask 261120  }
  0x5b   : > { %749 = vmatprep.subr.bf16.mxu0 %v987_v0  ;;  %753 = vmatprep.mubr.msk.bf16.mxu0 %vm988_vm0, %v987_v0  ;;  %v834_v3 = vld [vmem:[%s281_s13] sm:$0xff]   ;;  %p338_p0 = scmp.lt.s32.totalorder %s973_s21, 1  ;;  %s989_s24 = smov 64  }
  0x5c   : > { %750 = vmatpush3.bf16.msra.mxu0 %v832_v1  ;;  %s990_s16 = smov 96   ;;  %s1218_s17 = scalar_lea.vmem [#allocation7], %s717_s12 }
  0x5d   : > { %751 = vmatprep.subr.bf16.mxu0 %v987_v0  ;;  %s1205_s11 = scalar_select %p338_p0, %s973_s21, 1 }
  0x5e   : > { %s991_s13 = smov 32   ;;  %s537_s12 = sshll.u32 %s1218_s17, 4  ;;  %s1231_s12 = int_to_ptr.vmem [resolvable:$true] %s537_s12 }
  0x5f   : > { %s340_s14 = scalar_lea.vmem %s1294_s2, %s1205_s11  ;;  %s343_s27 = scalar_lea.vmem %s1295_s3, %s1205_s11 }
  0x60   : > { %752 = vmatpush3.bf16.msra.mxu0 %v833_v2  ;;  %v722_v4 = vld [vmem:[%s340_s14] ss:$0 sm:$0xff]  ;;  %s740_s0 = sshll.u32 %s973_s21, 7  ;;  %s513_s15 = scalar_lea.sflag [#allocation4], %s1186_s10 }
  0x61   : > { %v729_v6 = vld [vmem:[%s343_s27] ss:$0 sm:$0xff]  ;;  %s1237_s30 = scalar_lea.hbm %s1296_s4, %s740_s0  ;;  %s895_s14 = scalar_lea.vmem %s1231_s12, 128 }
  0x62   : > { %p896_p3 = scmp.ne.s32.totalorder %s1231_s12, %s895_s14  ;;  %p1312_p12 = scmp.ne.s32.totalorder %s1304_s6, 0 }
  0x63   : > { %754 = vmatmul.mubr.msk.bf16.vlgmr.msra.gmra.mrb[0].mxu0 %vm386_vm1, %v834_v3  ;;  %s992_s28 = smov [#allocation7]  }
  0x64   : > { %p897_p13 = pnand %p896_p3, %p1312_p12  ;;  %s899_s25 = sshll.u32 %s992_s28, 4  ;;  %s900_s25 = int_to_ptr.vmem [resolvable:$false] %s899_s25 }
  0x65   : > { %s901_s27 = scalar_lea.vmem %s900_s25, 256  ;;  %p902_p10 = scmp.lt.s32.totalorder %s1231_s12, %s900_s25 }
  0x66   : > { %p898_p7 = pneg %p897_p13  ;;  %p903_p9 = scmp.lt.s32.totalorder %s901_s27, %s895_s14 }
  0x68   : > { %p904_p11 = por %p903_p9, %p902_p10 }
  0x6a   : > { %p905_p1 = pnand %p904_p11, %p898_p7 }
 0x136   : > { %v424_v5 = vpop.f32.mrb[0].mxu0 }
 0x137   : > { %v425_v7 = vadd.f32 %v722_v4, %v424_v5  ;;  %v755_v8 = vpop.f32.mrb[1].mxu0 }
 0x138   : > { %v427_v9 = vpop.f32.mrb[2].mxu0 }
 0x139   : > { %v448_v10 = vmul.f32 %v729_v6, %v425_v7  ;;  %v428_v11 = vadd.f32 %v722_v4, %v427_v9  ;;  %v756_v12 = vpop.f32.mrb[3].mxu0 }
 0x13b   : > { %v744_v13 = vpack.c.bf16 %v428_v11, %v425_v7  ;;  %470 = vrot.lane.b32.xlu1 %v448_v10, %s989_s24  ;;  %458 = vrot.lane.b32.xlu0 %v448_v10, %s990_s16  ;;  %v449_v14 = vmul.f32 %v729_v6, %v428_v11  ;;  %v450_v15 = vsel %vm386_vm1, %v448_v10, 0.0 }
 0x13d   : > { %745 = vst [vmem:[%s1218_s17] sm:$0xff] %v744_v13   ;;  %v453_v16 = vsel %vm386_vm1, %v449_v14, 0.0 }
 0x13f   : > { %472 = vrot.lane.b32.xlu1 %v449_v14, %s989_s24  ;;  %460 = vrot.lane.b32.xlu0 %v449_v14, %s990_s16 }
 0x143   : > { %484 = vrot.lane.b32.xlu1 %v449_v14, %s991_s13  ;;  %482 = vrot.lane.b32.xlu0 %v448_v10, %s991_s13 }
 0x162   : > { %451 = vadd.xlane.f32.xlu0 %v450_v15 }
 0x167   : > { %454 = vadd.xlane.f32.xlu1 %v453_v16 }
 0x1ad   : > { %v471_v17 = vpop.permute.xlu1 %470  ;;  %v459_v18 = vpop.permute.xlu0 %458 }
 0x1ae   : > { %v464_v19 = vsel %vm386_vm1, %v459_v18, 0.0  ;;  %v476_v20 = vsel %vm386_vm1, %v471_v17, 0.0 }
 0x1af   : > { %465 = vadd.xlane.f32.xlu0 %v464_v19  ;;  %477 = vadd.xlane.f32.xlu1 %v476_v20 }
 0x1b1   : > { %v473_v21 = vpop.permute.xlu1 %472  ;;  %v461_v22 = vpop.permute.xlu0 %460 }
 0x1b2   : > { %v467_v23 = vsel %vm386_vm1, %v461_v22, 0.0  ;;  %v479_v25 = vsel %vm386_vm1, %v473_v21, 0.0 }
 0x1b3   : > { %468 = vadd.xlane.f32.xlu0 %v467_v23 }
 0x1b5   : > { %v483_v24 = vpop.permute.xlu0 %482  ;;  %v485_v27 = vpop.permute.xlu1 %484 }
 0x1b6   : > { %v488_v26 = vsel %vm386_vm1, %v483_v24, 0.0  ;;  %v491_v28 = vsel %vm386_vm1, %v485_v27, 0.0 }
 0x1b7   : > { %480 = vadd.xlane.f32.xlu0 %v479_v25  ;;  %489 = vadd.xlane.f32.xlu1 %v488_v26 }
 0x1bb   : > { %492 = vadd.xlane.f32.xlu0 %v491_v28 }
 0x1bc   : > { %908 = shalt.err (!%p905_p1)
}
 0x1bd   : > { %s909_s21 = scalar_lea.hbm %s1237_s30, 128  ;;  %s913_s13 = scalar_lea.hbm %s1296_s4, 256 }
 0x1be   : > { %p910_p6 = scmp.ne.s32.totalorder %s1237_s30, %s909_s21  ;;  %p914_p4 = scmp.lt.u32.totalorder %s1237_s30, %s1296_s4 }
 0x1bf   : > { %p915_p8 = scmp.lt.u32.totalorder %s913_s13, %s909_s21  ;;  %p917_p3 = scmp.lt.u32.totalorder %s909_s21, %s1237_s30 }
 0x1c0   : > { %p911_p2 = pnand %p910_p6, %p1312_p12 }
 0x1c1   : > { %p916_p0 = por %p915_p8, %p914_p4 }
 0x1c2   : > { %p912_p5 = pneg %p911_p2 }
 0x1c3   : > { %p918_p13 = por %p917_p3, %p916_p0 }
 0x1c5   : > { %p919_p7 = pnand %p918_p13, %p912_p5 }
 0x1c7   : > { %922 = shalt.err (!%p919_p7)
}
 0x1c8   : > { %s993_s29 = smov 4   ;;  %vm494_vm2 = vcmask 7168   ;;  %vm497_vm3 = vcmask 15360   ;;  %vm500_vm4 = vcmask 23552   ;;  %s737_s14 = sshll.u32 %s1205_s11, 4  ;;  %vm509_vm5 = vcmask 31744  }
 0x1c9   : > { %761 = dma.vmem_to_hbm [thread:$0]  (%p1312_p12), %s1231_s12, 128, %s1237_s30, %s513_s15, %s989_s24, %s989_s24, %s993_s29  }
 0x1ca   : > { %s353_s28 = scalar_lea.vmem %s1297_s5, %s737_s14 }
 0x1ef   : > { %v452_v29 = vpop.xlane.xlu0 %451 }
 0x1f4   : > { %v455_v30 = vpop.xlane.xlu1 %454 }
 0x23c   : > { %v466_v31 = vpop.xlane.xlu0 %465  ;;  %v478_v32 = vpop.xlane.xlu1 %477 }
 0x23d   : > { %v495_v34 = vsel %vm494_vm2, %v452_v29, %v466_v31 }
 0x23e   : > { %v498_v35 = vsel %vm497_vm3, %v495_v34, %v478_v32 }
 0x240   : > { %v469_v33 = vpop.xlane.xlu0 %468 }
 0x241   : > { %v496_v40 = vsel %vm494_vm2, %v455_v30, %v469_v33 }
 0x244   : > { %v481_v36 = vpop.xlane.xlu0 %480  ;;  %v490_v37 = vpop.xlane.xlu1 %489 }
 0x245   : > { %v501_v38 = vsel %vm500_vm4, %v498_v35, %v490_v37  ;;  %v499_v41 = vsel %vm497_vm3, %v496_v40, %v481_v36 }
 0x246   : > { %vm503_vm6 = vcmp.ge.f32.partialorder %v501_v38, 0.0  ;;  %v505_v39 = vmul.f32 0.01, %v501_v38 }
 0x248   : > { %v507_v42 = vsel %vm503_vm6, %v501_v38, %v505_v39  ;;  %v493_v43 = vpop.xlane.xlu0 %492 }
 0x249   : > { %510 = vst.msk [vmem:[%s353_s28] sm:$0xff] %vm509_vm5, %v507_v42  ;;  %v502_v44 = vsel %vm500_vm4, %v499_v41, %v493_v43 }
 0x24a   : > { %vm504_vm7 = vcmp.ge.f32.partialorder %v502_v44, 0.0  ;;  %v506_v45 = vmul.f32 0.01, %v502_v44 }
 0x24c   : > { %v508_v46 = vsel %vm504_vm7, %v502_v44, %v506_v45 }
 0x24d   : > { %511 = vst.msk [vmem:[%s353_s28 + $0x8] sm:$0xff] %vm509_vm5, %v508_v46 }
 0x24e PF: > { %s556_s11 = sand.u32 1, %s961_s18   ;;  %p1313_p12 = scmp.ne.s32.totalorder %s1305_s8, 0 }
 0x24f   : > { %p1314_p10 = scmp.ge.s32.totalorder %s981_s23, 2  ;;  %s557_s24 = scalar_lea.sflag [#allocation4], %s556_s11 }
 0x251   : > { %p771_p9 = pnand %p1314_p10, %p1313_p12 }
 0x253   : > { %956 = dma.done.wait (!%p771_p9), %s557_s24, 128  }
 0x254   : > { %958 = vsyncadd (!%p771_p9), %s557_s24, 4294967168  ;;  %s25_s23 = sadd.s32 1, %s981_s23   ;;  %s1315_s18 = smov %s965_s19 }
 0x255   : > { %p22_p11 = scmp.ge.s32.totalorder %s25_s23, 4   ;;  %s1316_s19 = smov %s969_s20 }
 0x256   : > { %s1317_s20 = smov %s1080_s7  ;;  %s1318_s21 = smov %s977_s22 }
 0x257   : > { %s1319_s22 = smov %s1321_s26  ;;  %24 = sbr.rel (!%p22_p11) target bundleno = 10 (0xa), region = 112 }
 0x25e   :  { %574 = vsyncpa [#allocation3], 1 }
 0x25f   :  { %576 = vsyncpa [#allocation3 + $0x1], 1 }
 0x260   :  { %577 = vsyncpa [#allocation6], 1 }
 0x261   :  { %579 = vsyncpa [#allocation6 + $0x1], 1 }
 0x262   :  { %580 = vsyncpa [#allocation4], 1 }
 0x263   :  { %582 = vsyncpa [#allocation4 + $0x1], 1 }

</bundles_post_ra>
